<compile_context>
chip_gen: v6e
topology: v6e:2x2x1
jax: 0.10.0
libtpu: 0.0.40
codegen_flags: <defaults>
</compile_context>

<pallas_src>
import functools
import math

import jax
import jax.numpy as jnp
from jax import lax
from jax.experimental import pallas as pl
from jax.experimental.pallas import tpu as pltpu

EPS = 1e-6
TILE_M = 1024         # row tile for the patchify matmuls (multiple of 8)
HEAD_PAD = 128        # lane-dense padded class width for head/fc/softmax
SLAB_ROWS = 512       # target flattened rows per MLP slab inside the block kernel

VMEM_SPEC = pl.BlockSpec(memory_space=pltpu.MemorySpace.VMEM)


def _vmem_specs(n):
    return [pl.BlockSpec(memory_space=pltpu.MemorySpace.VMEM) for _ in range(n)]


def _vmem_limit(nbytes):
    """Document the VMEM budget explicitly (generous margin, clamped to HW range)."""
    return int(min(64 << 20, max(16 << 20, 2 * int(nbytes) + (4 << 20))))


def _slab_rows(H, W, target=SLAB_ROWS):
    """Rows of H per MLP slab: whole image if small, else the largest divisor of H
    keeping hrows*W <= target flattened rows."""
    if H * W <= target:
        return H
    best = 1
    for d in range(1, H + 1):
        if H % d == 0 and d * W <= target:
            best = d
    return best


# ============================================================================ kernels

def _block_kernel(x_ref, dw_w_ref, dw_b_ref, lng_ref, lnb_ref, w1_ref, b1_ref,
                  w2_ref, b2_ref, gamma_ref, pg_ref, pb_ref, o_ref, xpad_ref,
                  *, H, W, eps, hrows, fuse_post_ln):
    """Fused ConvNeXt block for one image:
    dwconv7 -> LN -> MLP(GELU) -> layer-scale -> residual [-> next-stage pre-LN]."""
    C = x_ref.shape[-1]
    PW = xpad_ref.shape[1]                                # W + 16
    x = x_ref[0].astype(jnp.float32)                      # (H, W, C) f32

    # ---- depthwise 7x7 conv.  Only the 3-wide halo strips are zeroed (interior is
    #      fully overwritten every step); interior write lands at sublane-aligned
    #      column offset 8 -> unmasked stores.
    xpad_ref[0:3, :, :] = jnp.zeros((3, PW, C), jnp.float32)
    xpad_ref[3 + H:6 + H, :, :] = jnp.zeros((3, PW, C), jnp.float32)
    xpad_ref[3:3 + H, 5:8, :] = jnp.zeros((H, 3, C), jnp.float32)
    xpad_ref[3:3 + H, 8 + W:11 + W, :] = jnp.zeros((H, 3, C), jnp.float32)
    xpad_ref[3:3 + H, 8:8 + W, :] = x
    xp = xpad_ref[...]

    w = dw_w_ref[...]                                     # (49, C)
    acc = jnp.zeros((H, W, C), jnp.float32)
    # W-direction (sublane) shifts hoisted out of the 49-tap loop: 7 realignment
    # slices instead of 49; the kh slices are cheap leading-dim slices.
    for kw in range(7):
        xw = xp[:, 5 + kw:5 + kw + W, :]                  # (H+6, W, C)
        for kh in range(7):
            acc = acc + xw[kh:kh + H] * w[kh * 7 + kw]
    y = (acc + dw_b_ref[...]).reshape(H * W, C)
    xres = x.reshape(H * W, C)

    lng = lng_ref[...]
    lnb = lnb_ref[...]
    w1 = w1_ref[...]
    b1 = b1_ref[...]
    w2 = w2_ref[...]
    b2 = b2_ref[...]
    gamma = gamma_ref[...]

    # ---- LN -> MLP(GELU, exact erf) -> layer-scale -> residual, tiled over row
    #      slabs so the (rows, 4C) intermediates stay bounded at real image sizes.
    n_slabs = H // hrows
    rows = hrows * W
    for s in range(n_slabs):
        r0 = s * rows
        yb = y[r0:r0 + rows]
        xb = xres[r0:r0 + rows]
        mean = jnp.mean(yb, axis=-1, keepdims=True)
        yc = yb - mean
        var = jnp.mean(yc * yc, axis=-1, keepdims=True)
        yn = yc * lax.rsqrt(var + eps) * lng + lnb
        h = jnp.dot(yn.astype(jnp.bfloat16), w1,
                    preferred_element_type=jnp.float32) + b1
        h = 0.5 * h * (1.0 + lax.erf(h * (1.0 / math.sqrt(2.0))))
        z = jnp.dot(h.astype(jnp.bfloat16), w2,
                    preferred_element_type=jnp.float32) + b2
        out = xb + gamma * z                              # residual add in f32
        if fuse_post_ln:
            # Next stage's downsample pre-LayerNorm fused as an epilogue.
            m2 = jnp.mean(out, axis=-1, keepdims=True)
            oc = out - m2
            v2 = jnp.mean(oc * oc, axis=-1, keepdims=True)
            out = oc * lax.rsqrt(v2 + eps) * pg_ref[...] + pb_ref[...]
        o_ref[:, s * hrows:(s + 1) * hrows, :, :] = (
            out.reshape(1, hrows, W, C).astype(o_ref.dtype))


def convnext_block(x_nhwc, blk):
    B, H, W, C = x_nhwc.shape
    Hd = blk["w1"].shape[1]                               # 4*C
    fuse_post_ln = blk["post_g"] is not None
    dummy = jnp.zeros((1, 1), jnp.float32)
    pg = blk["post_g"] if fuse_post_ln else dummy
    pb = blk["post_b"] if fuse_post_ln else dummy
    hrows = _slab_rows(H, W)

    est = (4 * H * W * C * 2                              # in+out blocks (bf16), dbl-buf
           + (H + 6) * (W + 16) * C * 4                   # padded dwconv scratch (f32)
           + (49 + 12) * C * 4                            # dw weights + per-channel params
           + 8 * C * Hd                                   # w1+w2 (bf16), double-buffered
           + 3 * hrows * W * Hd * 4)                      # slab MLP intermediates (f32)

    return pl.pallas_call(
        functools.partial(_block_kernel, H=H, W=W, eps=EPS, hrows=hrows,
                          fuse_post_ln=fuse_post_ln),
        out_shape=jax.ShapeDtypeStruct((B, H, W, C), jnp.bfloat16),
        grid=(B,),
        in_specs=[
            pl.BlockSpec((1, H, W, C), lambda b: (b, 0, 0, 0)),   # x (bf16)
            pl.BlockSpec((49, C), lambda b: (0, 0)),              # dw weights (f32)
            pl.BlockSpec((1, C), lambda b: (0, 0)),               # dw bias
            pl.BlockSpec((1, C), lambda b: (0, 0)),               # ln gamma
            pl.BlockSpec((1, C), lambda b: (0, 0)),               # ln beta
            pl.BlockSpec((C, Hd), lambda b: (0, 0)),              # w1 (bf16)
            pl.BlockSpec((1, Hd), lambda b: (0, 0)),              # b1
            pl.BlockSpec((Hd, C), lambda b: (0, 0)),              # w2 (bf16)
            pl.BlockSpec((1, C), lambda b: (0, 0)),               # b2
            pl.BlockSpec((1, C), lambda b: (0, 0)),               # layer-scale gamma
            pl.BlockSpec(pg.shape, lambda b: (0, 0)),             # fused post-LN gamma
            pl.BlockSpec(pb.shape, lambda b: (0, 0)),             # fused post-LN beta
        ],
        out_specs=pl.BlockSpec((1, H, W, C), lambda b: (b, 0, 0, 0)),
        scratch_shapes=[pltpu.VMEM((H + 6, W + 16, C), jnp.float32)],
        compiler_params=pltpu.CompilerParams(
            dimension_semantics=("parallel",),
            vmem_limit_bytes=_vmem_limit(est)),
    )(x_nhwc, blk["dw_w"], blk["dw_b"], blk["ln_g"], blk["ln_b"],
      blk["w1"], blk["b1"], blk["w2"], blk["b2"], blk["gamma"], pg, pb)


def _patchify_kernel(p_ref, w_ref, b_ref, g_ref, bb_ref, o_ref, *, eps, ln_post):
    """Dense patch matmul (bf16 x bf16 -> f32) with optional fused post-LayerNorm."""
    out = jnp.dot(p_ref[...], w_ref[...],
                  preferred_element_type=jnp.float32) + b_ref[...]
    if ln_post:
        mean = jnp.mean(out, axis=-1, keepdims=True)
        oc = out - mean
        var = jnp.mean(oc * oc, axis=-1, keepdims=True)
        out = oc * lax.rsqrt(var + eps) * g_ref[...] + bb_ref[...]
    o_ref[...] = out.astype(o_ref.dtype)


def fused_patchify(x_nhwc, wmat_bf16, bias, k, ln_post=None):
    """Non-overlapping kxk s=k conv as a row-tiled dense patch matmul.
    The patch matrix is built (and shipped) in bf16; output activation is bf16."""
    B, H, W, Cin = x_nhwc.shape
    Cout = wmat_bf16.shape[1]
    Ho, Wo = H // k, W // k
    patches = (x_nhwc.reshape(B, Ho, k, Wo, k, Cin)
               .transpose(0, 1, 3, 2, 4, 5)
               .reshape(B * Ho * Wo, k * k * Cin)).astype(jnp.bfloat16)
    M, K = patches.shape
    tm = M if M <= TILE_M else TILE_M
    grid = (pl.cdiv(M, tm),)

    dummy = jnp.zeros((1, 1), jnp.float32)
    g, bb = ln_post if ln_post is not None else (dummy, dummy)

    est = 2 * tm * K * 2 + 2 * tm * Cout * 2 + 2 * K * Cout * 2 + tm * Cout * 4

    out = pl.pallas_call(
        functools.partial(_patchify_kernel, eps=EPS, ln_post=ln_post is not None),
        out_shape=jax.ShapeDtypeStruct((M, Cout), jnp.bfloat16),
        grid=grid,
        in_specs=[
            pl.BlockSpec((tm, K), lambda i: (i, 0)),               # patches (bf16)
            pl.BlockSpec((K, Cout), lambda i: (0, 0)),             # weight (bf16)
            pl.BlockSpec((1, Cout), lambda i: (0, 0)),             # bias (f32)
            pl.BlockSpec(g.shape, lambda i: (0, 0)),               # post-LN gamma
            pl.BlockSpec(bb.shape, lambda i: (0, 0)),              # post-LN beta
        ],
        out_specs=pl.BlockSpec((tm, Cout), lambda i: (i, 0)),
        compiler_params=pltpu.CompilerParams(
            dimension_semantics=("parallel",),
            vmem_limit_bytes=_vmem_limit(est)),
    )(patches, wmat_bf16, bias, g, bb)
    return out.reshape(B, Ho, Wo, Cout)


def _head_kernel(x_ref, g_ref, b_ref, hw_ref, hb_ref, fw_ref, fb_ref, o_ref,
                 *, eps, n_valid):
    """Fused: global avg pool -> LN -> head Linear -> fc Linear -> softmax (lane-padded)."""
    p = jnp.mean(x_ref[...].astype(jnp.float32), axis=1)          # (B, C)  avg pool
    mean = jnp.mean(p, axis=-1, keepdims=True)
    pc = p - mean
    var = jnp.mean(pc * pc, axis=-1, keepdims=True)
    pn = pc * lax.rsqrt(var + eps) * g_ref[...] + b_ref[...]
    logits = jnp.dot(pn.astype(jnp.bfloat16), hw_ref[...],
                     preferred_element_type=jnp.float32) + hb_ref[...]
    # TODO(synk): nn.Dropout is identity in eval mode; training-mode dropout not implemented.
    logits = jnp.dot(logits.astype(jnp.bfloat16), fw_ref[...],
                     preferred_element_type=jnp.float32) + fb_ref[...]
    col = lax.broadcasted_iota(jnp.int32, logits.shape, 1)
    neg = jnp.float32(jnp.finfo(jnp.float32).min / 2)             # dtype-aware mask value
    logits = jnp.where(col < n_valid, logits, neg)                # mask padded classes
    m = jnp.max(logits, axis=-1, keepdims=True)
    e = jnp.exp(logits - m)
    o_ref[...] = e / jnp.sum(e, axis=-1, keepdims=True)


def head_fc_softmax(x_nhwc, hp):
    B, H, W, C = x_nhwc.shape
    x = x_nhwc.reshape(B, H * W, C)
    out = pl.pallas_call(
        functools.partial(_head_kernel, eps=EPS, n_valid=hp["num_classes"]),
        out_shape=jax.ShapeDtypeStruct((B, hp["npad"]), jnp.float32),
        in_specs=_vmem_specs(7),
        out_specs=VMEM_SPEC,
    )(x, hp["ng"], hp["nb"], hp["head_w"], hp["head_b"], hp["fc_w"], hp["fc_b"])
    return out[:, :hp["num_classes"]]


# ======================================================================= model plumbing

def prepare_params(raw):
    """One-time weight reshape / transpose / bf16 cast, hoisted out of the forward pass."""
    def as_row(v):
        return v.reshape(1, -1).astype(jnp.float32)

    def conv_to_matmul(w_pt):                       # (Cout, Cin, k, k) -> (k*k*Cin, Cout)
        cout = w_pt.shape[0]
        return jnp.transpose(w_pt, (2, 3, 1, 0)).reshape(-1, cout).astype(jnp.bfloat16)

    p = {
        "stem": dict(
            wmat=conv_to_matmul(raw["stem_w"]), b=as_row(raw["stem_b"]),
            post_g=as_row(raw["stem_ng"]), post_b=as_row(raw["stem_nb"]),
        ),
        "stages": [],
    }
    n_stages = len(raw["stages"])
    for si, st in enumerate(raw["stages"]):
        s = {"blocks": []}
        if si > 0:
            # Downsample conv only; its pre-LN is fused into the previous stage's last block.
            s["ds"] = dict(wmat=conv_to_matmul(st["ds_w"]), b=as_row(st["ds_b"]))
        for blk in st["blocks"]:
            C = blk["dw_b"].shape[0]
            s["blocks"].append(dict(
                dw_w=jnp.transpose(blk["dw_w"][:, 0], (1, 2, 0)).reshape(49, C),
                dw_b=as_row(blk["dw_b"]),
                ln_g=as_row(blk["ln_g"]), ln_b=as_row(blk["ln_b"]),
                w1=blk["w1"].T.astype(jnp.bfloat16), b1=as_row(blk["b1"]),
                w2=blk["w2"].T.astype(jnp.bfloat16), b2=as_row(blk["b2"]),
                gamma=as_row(blk["gamma"]),
                post_g=None, post_b=None,
            ))
        p["stages"].append(s)

    # Fuse each downsample's pre-LayerNorm into the previous stage's last block epilogue.
    for si in range(1, n_stages):
        p["stages"][si - 1]["blocks"][-1]["post_g"] = as_row(raw["stages"][si]["ds_ng"])
        p["stages"][si - 1]["blocks"][-1]["post_b"] = as_row(raw["stages"][si]["ds_nb"])

    C = raw["head_ng"].shape[0]
    N = raw["head_w"].shape[0]
    NP = HEAD_PAD
    head_w = (jnp.zeros((C, NP), jnp.float32).at[:, :N].set(raw["head_w"].T)
              .astype(jnp.bfloat16))
    head_b = jnp.zeros((1, NP), jnp.float32).at[:, :N].set(raw["head_b"])
    fc_w = (jnp.zeros((NP, NP), jnp.float32).at[:N, :N].set(raw["fc_w"].T)
            .astype(jnp.bfloat16))
    fc_b = jnp.zeros((1, NP), jnp.float32).at[:, :N].set(raw["fc_b"])
    p["head"] = dict(ng=as_row(raw["head_ng"]), nb=as_row(raw["head_nb"]),
                     head_w=head_w, head_b=head_b, fc_w=fc_w, fc_b=fc_b,
                     num_classes=N, npad=NP)
    return p


def convnext_tiny_forward(prep, x_nchw):
    x = jnp.transpose(x_nchw, (0, 2, 3, 1)).astype(jnp.float32)      # NCHW -> NHWC
    stem = prep["stem"]
    x = fused_patchify(x, stem["wmat"], stem["b"], k=4,
                       ln_post=(stem["post_g"], stem["post_b"]))      # conv4x4 s4 + LN
    for si, stage in enumerate(prep["stages"]):
        if si > 0:
            ds = stage["ds"]
            x = fused_patchify(x, ds["wmat"], ds["b"], k=2)           # conv2x2 s2
        for blk in stage["blocks"]:
            x = convnext_block(x, blk)                                # fused block (bf16 io)
    return head_fc_softmax(x, prep["head"])                           # pool+LN+fc+fc+softmax


def init_params(key, num_classes=10, dims=(8, 16, 32, 64), depths=(1, 1, 2, 1), in_chans=3):
    keys = iter(jax.random.split(key, 512))

    def nrm(shape, scale=0.02):
        return scale * jax.random.normal(next(keys), shape, jnp.float32)

    z = lambda s: jnp.zeros(s, jnp.float32)
    o = lambda s: jnp.ones(s, jnp.float32)

    params = {
        "stem_w": nrm((dims[0], in_chans, 4, 4)), "stem_b": z((dims[0],)),
        "stem_ng": o((dims[0],)), "stem_nb": z((dims[0],)),
        "stages": [],
    }
    for i, (d, depth) in enumerate(zip(dims, depths)):
        st = {}
        if i > 0:
            st["ds_ng"] = o((dims[i - 1],))
            st["ds_nb"] = z((dims[i - 1],))
            st["ds_w"] = nrm((d, dims[i - 1], 2, 2))
            st["ds_b"] = z((d,))
        st["blocks"] = []
        for _ in range(depth):
            st["blocks"].append(dict(
                dw_w=nrm((d, 1, 7, 7)), dw_b=z((d,)),
                ln_g=o((d,)), ln_b=z((d,)),
                w1=nrm((4 * d, d)), b1=z((4 * d,)),     # PyTorch Linear: (out, in)
                w2=nrm((d, 4 * d)), b2=z((d,)),
                gamma=jnp.full((d,), 1e-6, jnp.float32),
            ))
        params["stages"].append(st)
    params["head_ng"] = o((dims[-1],))
    params["head_nb"] = z((dims[-1],))
    params["head_w"] = nrm((num_classes, dims[-1]))
    params["head_b"] = z((num_classes,))
    params["fc_w"] = nrm((num_classes, num_classes))
    params["fc_b"] = z((num_classes,))
    return params


if __name__ == "__main__":
    num_classes = 10
    key = jax.random.PRNGKey(0)
    kx, kp = jax.random.split(key)
    x = jax.random.normal(kx, (2, 3, 32, 32), jnp.float32)   # NCHW, like PyTorch
    raw_params = init_params(kp, num_classes=num_classes)
    prep = prepare_params(raw_params)

    out = convnext_tiny_forward(prep, x)
    out = jax.block_until_ready(out)

    assert out.shape == (2, num_classes), out.shape
    row_sums = jnp.sum(out, axis=1)
    assert bool(jnp.all(jnp.abs(row_sums - 1.0) < 1e-4)), row_sums
    assert bool(jnp.all(jnp.isfinite(out)))
    print("KERNEL_OK")
</pallas_src>

<mosaic_0001>
module attributes {stable_mosaic.version = 11 : i64} {
  func.func @_patchify_kernel(%arg0: i32, %arg1: memref<128x48xbf16, #tpu.memory_space<vmem>>, %arg2: memref<48x8xbf16, #tpu.memory_space<vmem>>, %arg3: memref<1x8xf32, #tpu.memory_space<vmem>>, %arg4: memref<1x8xf32, #tpu.memory_space<vmem>>, %arg5: memref<1x8xf32, #tpu.memory_space<vmem>>, %arg6: memref<128x8xbf16, #tpu.memory_space<vmem>>) attributes {dimension_semantics = [#tpu.dimension_semantics<parallel>], iteration_bounds = array<i64: 1>, scalar_prefetch = 0 : i64, scratch_operands = 0 : i64, tpu.core_type = #tpu.core_type<tc>, window_params = [{transform_indices = @transform_0, window_bounds = array<i64: 128, 48>}, {pipeline_mode = #tpu.pipeline_mode<synchronous>, transform_indices = @transform_1, window_bounds = array<i64: 48, 8>}, {pipeline_mode = #tpu.pipeline_mode<synchronous>, transform_indices = @transform_2, window_bounds = array<i64: 1, 8>}, {pipeline_mode = #tpu.pipeline_mode<synchronous>, transform_indices = @transform_3, window_bounds = array<i64: 1, 8>}, {pipeline_mode = #tpu.pipeline_mode<synchronous>, transform_indices = @transform_4, window_bounds = array<i64: 1, 8>}, {transform_indices = @transform_5, window_bounds = array<i64: 128, 8>}]} {
    %c0 = arith.constant 0 : index
    %c0_0 = arith.constant 0 : index
    %0 = vector.load %arg1[%c0, %c0_0] : memref<128x48xbf16, #tpu.memory_space<vmem>>, vector<128x48xbf16>
    %c0_1 = arith.constant 0 : index
    %c0_2 = arith.constant 0 : index
    %1 = vector.load %arg2[%c0_1, %c0_2] : memref<48x8xbf16, #tpu.memory_space<vmem>>, vector<48x8xbf16>
    %cst = arith.constant dense<0.000000e+00> : vector<128x8xf32>
    %2 = tpu.matmul %0, %1, %cst {dimension_numbers = #tpu.dot_dimension_numbers<[1], [0], [0], [1], [0, 0, 1, 1], [], []>} : vector<128x48xbf16>, vector<48x8xbf16>, vector<128x8xf32> -> vector<128x8xf32>
    %c0_3 = arith.constant 0 : index
    %c0_4 = arith.constant 0 : index
    %3 = vector.load %arg3[%c0_3, %c0_4] : memref<1x8xf32, #tpu.memory_space<vmem>>, vector<1x8xf32>
    %4 = vector.broadcast %3 : vector<1x8xf32> to vector<128x8xf32>
    %5 = arith.addf %2, %4 : vector<128x8xf32>
    %cst_5 = arith.constant dense<0.000000e+00> : vector<128xf32>
    %6 = vector.multi_reduction <add>, %5, %cst_5 [1] : vector<128x8xf32> to vector<128xf32>
    %7 = vector.shape_cast %6 : vector<128xf32> to vector<128x1xf32>
    %cst_6 = arith.constant 8.000000e+00 : f32
    %8 = vector.broadcast %cst_6 : f32 to vector<128x1xf32>
    %9 = arith.divf %7, %8 : vector<128x1xf32>
    %10 = vector.broadcast %9 : vector<128x1xf32> to vector<128x8xf32>
    %11 = arith.subf %5, %10 : vector<128x8xf32>
    %12 = arith.mulf %11, %11 : vector<128x8xf32>
    %cst_7 = arith.constant dense<0.000000e+00> : vector<128xf32>
    %13 = vector.multi_reduction <add>, %12, %cst_7 [1] : vector<128x8xf32> to vector<128xf32>
    %14 = vector.shape_cast %13 : vector<128xf32> to vector<128x1xf32>
    %cst_8 = arith.constant 8.000000e+00 : f32
    %15 = vector.broadcast %cst_8 : f32 to vector<128x1xf32>
    %16 = arith.divf %14, %15 : vector<128x1xf32>
    %cst_9 = arith.constant 9.99999997E-7 : f32
    %17 = vector.broadcast %cst_9 : f32 to vector<128x1xf32>
    %18 = arith.addf %16, %17 : vector<128x1xf32>
    %19 = math.rsqrt %18 : vector<128x1xf32>
    %20 = vector.broadcast %19 : vector<128x1xf32> to vector<128x8xf32>
    %21 = arith.mulf %11, %20 : vector<128x8xf32>
    %c0_10 = arith.constant 0 : index
    %c0_11 = arith.constant 0 : index
    %22 = vector.load %arg4[%c0_10, %c0_11] : memref<1x8xf32, #tpu.memory_space<vmem>>, vector<1x8xf32>
    %23 = vector.broadcast %22 : vector<1x8xf32> to vector<128x8xf32>
    %24 = arith.mulf %21, %23 : vector<128x8xf32>
    %c0_12 = arith.constant 0 : index
    %c0_13 = arith.constant 0 : index
    %25 = vector.load %arg5[%c0_12, %c0_13] : memref<1x8xf32, #tpu.memory_space<vmem>>, vector<1x8xf32>
    %26 = vector.broadcast %25 : vector<1x8xf32> to vector<128x8xf32>
    %27 = arith.addf %24, %26 : vector<128x8xf32>
    %28 = arith.truncf %27 : vector<128x8xf32> to vector<128x8xbf16>
    %c0_14 = arith.constant 0 : index
    %c0_15 = arith.constant 0 : index
    %29 = vector.load %arg6[%c0_14, %c0_15] : memref<128x8xbf16, #tpu.memory_space<vmem>>, vector<128x8xbf16>
    tpu.vector_store %arg6[%c0_14, %c0_15], %28 {strides = array<i32>} : memref<128x8xbf16, #tpu.memory_space<vmem>>, vector<128x8xbf16>,
    return
  }
  func.func @transform_0(%arg0: i32) -> (i32, i32) {
    %c0_i32 = arith.constant 0 : i32
    %c0_i32_0 = arith.constant 0 : i32
    return %arg0, %c0_i32 : i32, i32
  }
  func.func @transform_1(%arg0: i32) -> (i32, i32) {
    %c0_i32 = arith.constant 0 : i32
    %c0_i32_0 = arith.constant 0 : i32
    %c0_i32_1 = arith.constant 0 : i32
    return %c0_i32, %c0_i32_0 : i32, i32
  }
  func.func @transform_2(%arg0: i32) -> (i32, i32) {
    %c0_i32 = arith.constant 0 : i32
    %c0_i32_0 = arith.constant 0 : i32
    %c0_i32_1 = arith.constant 0 : i32
    return %c0_i32, %c0_i32_0 : i32, i32
  }
  func.func @transform_3(%arg0: i32) -> (i32, i32) {
    %c0_i32 = arith.constant 0 : i32
    %c0_i32_0 = arith.constant 0 : i32
    %c0_i32_1 = arith.constant 0 : i32
    return %c0_i32, %c0_i32_0 : i32, i32
  }
  func.func @transform_4(%arg0: i32) -> (i32, i32) {
    %c0_i32 = arith.constant 0 : i32
    %c0_i32_0 = arith.constant 0 : i32
    %c0_i32_1 = arith.constant 0 : i32
    return %c0_i32, %c0_i32_0 : i32, i32
  }
  func.func @transform_5(%arg0: i32) -> (i32, i32) {
    %c0_i32 = arith.constant 0 : i32
    %c0_i32_0 = arith.constant 0 : i32
    return %arg0, %c0_i32 : i32, i32
  }
}

</mosaic_0001>

<bundles_post_ra>
// kernel: tpu_custom_call.1
= control target key start
LH: loop header
LB: loop body
LE: loop exit
PB: predicated region body
PF: predicated region fallthrough
CT: control target
= control target key end

     0   :  { %vm108_vm0 = vcmask 392192   ;;  %vm230_vm1 = vcmask 64512   ;;  %vm550_vm2 = vcmask 60416   ;;  %s1059_s1 = inlined_call_operand.vmem [shape: bf16[48,8], index: 1, kind: input, shape index: {}]   ;;  %s1060_s0 = inlined_call_operand.vmem [shape: bf16[128,48], index: 0, kind: input, shape index: {}]   ;;  %s1061_s2 = inlined_call_operand.vmem [shape: f32[1,8], index: 2, kind: input, shape index: {}]   ;;  %s1062_s3 = inlined_call_operand.vmem [shape: f32[1,8], index: 3, kind: input, shape index: {}]   ;;  %s1063_s4 = inlined_call_operand.vmem [shape: f32[1,8], index: 4, kind: input, shape index: {}]   ;;  %s1064_s5 = inlined_call_operand.vmem [shape: bf16[128,8], index: 5, kind: output, shape index: {}]  }
   0x1   :  { %v664_v0 = vld [vmem:[%s1059_s1 + $0x10] sm:$0xff]   ;;  %v665_v1 = vld [vmem:[%s1059_s1 + $0x8] sm:$0xff]   ;;  %v666_v2 = vld [vmem:[%s1059_s1] sm:$0xff]  }
   0x2   :  { %636 = vmatprep.subr.bf16.mxu0 %v664_v0  ;;  %658 = vmatprep.subr.bf16.mxu1 %v664_v0  ;;  %v667_v3 = vld [vmem:[%s1060_s0] sm:$0xff]   ;;  %v669_v5 = vld [vmem:[%s1060_s0 + $0x8] sm:$0xff]   ;;  %v671_v7 = vld [vmem:[%s1060_s0 + $0x10] sm:$0xff]  }
   0x3   :  { %637 = vmatpush3.bf16.msra.mxu0 %v664_v0  ;;  %661 = vmatpush3.bf16.msra.mxu1 %v664_v0  ;;  %v668_v4 = vld [vmem:[%s1060_s0 + $0x20] sm:$0xff]   ;;  %v670_v6 = vld [vmem:[%s1060_s0 + $0x28] sm:$0xff]   ;;  %v673_v8 = vld [vmem:[%s1060_s0 + $0x30] sm:$0xff]  }
   0x4   :  { %638 = vmatprep.subr.bf16.mxu0 %v665_v1  ;;  %659 = vmatprep.subr.bf16.mxu1 %v665_v1  ;;  %v672_v9 = vld [vmem:[%s1060_s0 + $0x18] sm:$0xff]   ;;  %v571_v11 = vld [vmem:[%s1061_s2] ss:$0 sm:$0xff] }
   0x5   :  { %642 = vmatprep.mubr.msk.bf16.mxu0 %vm108_vm0, %v667_v3  ;;  %650 = vmatprep.mubr.msk.bf16.mxu1 %vm108_vm0, %v668_v4  ;;  %v674_v10 = vld [vmem:[%s1060_s0 + $0x38] sm:$0xff]  }
   0x7   :  { %639 = vmatpush3.bf16.msra.mxu0 %v665_v1  ;;  %662 = vmatpush3.bf16.msra.mxu1 %v665_v1 }
   0x8   :  { %640 = vmatprep.subr.bf16.mxu0 %v666_v2  ;;  %660 = vmatprep.subr.bf16.mxu1 %v666_v2 }
   0xb   :  { %641 = vmatpush3.bf16.msra.mxu0 %v666_v2  ;;  %663 = vmatpush3.bf16.msra.mxu1 %v666_v2 }
   0xe   :  { %643 = vmatmul.mubr.msk.bf16.vlgmr.msra.gmra.mxu0 %vm108_vm0, %v669_v5  ;;  %651 = vmatmul.mubr.msk.bf16.vlgmr.msra.gmra.mxu1 %vm108_vm0, %v670_v6 }
   0xf   :  { %646 = vmatprep.mubr.msk.bf16.mxu0 %vm108_vm0, %v671_v7  ;;  %654 = vmatprep.mubr.msk.bf16.mxu1 %vm108_vm0, %v673_v8 }
  0x16   :  { %647 = vmatmul.mubr.msk.bf16.gmra.mxu0 %vm108_vm0, %v672_v9  ;;  %655 = vmatmul.mubr.msk.bf16.gmra.mxu1 %vm108_vm0, %v674_v10 }
  0xce   :  { %v644_v12 = vpop.f32.mrf.mxu0  ;;  %v652_v13 = vpop.f32.mrf.mxu1 }
  0xcf   :  { %v781_v14 = vadd.f32 %v644_v12, %v571_v11  ;;  %v783_v15 = vadd.f32 %v652_v13, %v571_v11 }
  0xd0   :  { %v167_v16 = vpop.f32.mrf.mxu0  ;;  %v199_v17 = vpop.f32.mrf.mxu1 }
  0xd1   :  { %v785_v18 = vadd.f32 %v571_v11, %v167_v16  ;;  %v261_v19 = vsel %vm230_vm1, %v783_v15, 0.0  ;;  %v237_v20 = vsel %vm230_vm1, %v781_v14, 0.0  ;;  %v791_v26 = vadd.f32 %v571_v11, %v199_v17 }
  0xd2   :  { %262 = vadd.xlane.f32.xlu0 %v261_v19  ;;  %v653_v21 = vpop.f32.mrf.mxu1  ;;  %238 = vadd.xlane.f32.xlu1 %v237_v20  ;;  %v645_v22 = vpop.f32.mrf.mxu0 }
  0xd3   :  { %v179_v23 = vadd.f32 %v645_v22, %v571_v11  ;;  %v793_v27 = vadd.f32 %v653_v21, %v571_v11  ;;  %v231_v29 = vsel %vm230_vm1, %v785_v18, 0.0  ;;  %v255_v36 = vsel %vm230_vm1, %v791_v26, 0.0 }
  0xd4   :  { %v170_v24 = vpop.f32.mrf.mxu0  ;;  %v202_v25 = vpop.f32.mrf.mxu1 }
  0xd5   :  { %v240_v28 = vsel %vm230_vm1, %v179_v23, 0.0  ;;  %v798_v33 = vadd.f32 %v571_v11, %v170_v24  ;;  %v800_v34 = vadd.f32 %v571_v11, %v202_v25  ;;  %v264_v35 = vsel %vm230_vm1, %v793_v27, 0.0 }
  0xd6   :  { %241 = vadd.xlane.f32.xlu1 %v240_v28  ;;  %232 = vadd.xlane.f32.xlu0 %v231_v29  ;;  %v648_v30 = vpop.f32.mrf.mxu0  ;;  %v656_v31 = vpop.f32.mrf.mxu1 }
  0xd7   :  { %v806_v39 = vadd.f32 %v648_v30, %v571_v11  ;;  %v258_v41 = vsel %vm230_vm1, %v800_v34, 0.0  ;;  %v234_v42 = vsel %vm230_vm1, %v798_v33, 0.0  ;;  %v830_v54 = vadd.f32 %v656_v31, %v571_v11 }
  0xd8   :  { %v183_v32 = vpop.f32.mrf.mxu0  ;;  %v215_v38 = vpop.f32.mrf.mxu1 }
  0xd9   :  { %v249_v46 = vsel %vm230_vm1, %v806_v39, 0.0  ;;  %v818_v47 = vadd.f32 %v571_v11, %v183_v32  ;;  %v822_v50 = vadd.f32 %v571_v11, %v215_v38  ;;  %v273_v59 = vsel %vm230_vm1, %v830_v54, 0.0 }
  0xda   :  { %265 = vadd.xlane.f32.xlu1 %v264_v35  ;;  %256 = vadd.xlane.f32.xlu0 %v255_v36  ;;  %v649_v37 = vpop.f32.mrf.mxu0  ;;  %v657_v44 = vpop.f32.mrf.mxu1 }
  0xdb   :  { %v808_v40 = vadd.f32 %v649_v37, %v571_v11  ;;  %v243_v53 = vsel %vm230_vm1, %v818_v47, 0.0  ;;  %v832_v55 = vadd.f32 %v657_v44, %v571_v11  ;;  %v267_v57 = vsel %vm230_vm1, %v822_v50, 0.0 }
  0xdc   :  { %v186_v43 = vpop.f32.mrf.mxu0  ;;  %v218_v49 = vpop.f32.mrf.mxu1 }
  0xdd   :  { %v252_v45 = vsel %vm230_vm1, %v808_v40, 0.0  ;;  %v820_v48 = vadd.f32 %v571_v11, %v186_v43  ;;  %v824_v51 = vadd.f32 %v571_v11, %v218_v49  ;;  %v276_v58 = vsel %vm230_vm1, %v832_v55, 0.0 }
  0xde   :  { %259 = vadd.xlane.f32.xlu1 %v258_v41  ;;  %235 = vadd.xlane.f32.xlu0 %v234_v42 }
  0xdf   :  { %v246_v52 = vsel %vm230_vm1, %v820_v48, 0.0  ;;  %v270_v56 = vsel %vm230_vm1, %v824_v51, 0.0 }
  0xe2   :  { %253 = vadd.xlane.f32.xlu1 %v252_v45  ;;  %250 = vadd.xlane.f32.xlu0 %v249_v46 }
  0xe6   :  { %247 = vadd.xlane.f32.xlu1 %v246_v52  ;;  %244 = vadd.xlane.f32.xlu0 %v243_v53 }
  0xea   :  { %271 = vadd.xlane.f32.xlu1 %v270_v56  ;;  %268 = vadd.xlane.f32.xlu0 %v267_v57 }
  0xee   :  { %277 = vadd.xlane.f32.xlu1 %v276_v58  ;;  %274 = vadd.xlane.f32.xlu0 %v273_v59 }
 0x15b   :  { %v263_v60 = vpop.xlane.xlu0 %262  ;;  %v239_v61 = vpop.xlane.xlu1 %238 }
 0x15c   :  { %v290_v62 = vmul.f32 0.125, %v263_v60  ;;  %v282_v63 = vmul.f32 0.125, %v239_v61 }
 0x15e   :  { %v843_v0 = vsub.f32 %v783_v15, %v290_v62  ;;  %v846_v1 = vsub.f32 %v781_v14, %v282_v63 }
 0x15f   :  { %v242_v2 = vpop.xlane.xlu1 %241  ;;  %v233_v3 = vpop.xlane.xlu0 %232 }
 0x160   :  { %v283_v4 = vmul.f32 0.125, %v242_v2  ;;  %v280_v5 = vmul.f32 0.125, %v233_v3  ;;  %v314_v6 = vmul.f32 %v846_v1, %v846_v1  ;;  %v322_v10 = vmul.f32 %v843_v0, %v843_v0 }
 0x162   :  { %v850_v7 = vsub.f32 %v179_v23, %v283_v4  ;;  %v853_v8 = vsub.f32 %v785_v18, %v280_v5  ;;  %v334_v9 = vsel %vm230_vm1, %v314_v6, 0.0  ;;  %v358_v20 = vsel %vm230_vm1, %v322_v10, 0.0 }
 0x163   :  { %v266_v11 = vpop.xlane.xlu1 %265  ;;  %335 = vadd.xlane.f32.xlu0 %v334_v9  ;;  %v257_v12 = vpop.xlane.xlu0 %256 }
 0x164   :  { %v291_v13 = vmul.f32 0.125, %v266_v11  ;;  %v288_v14 = vmul.f32 0.125, %v257_v12  ;;  %v315_v15 = vmul.f32 %v850_v7, %v850_v7  ;;  %v312_v16 = vmul.f32 %v853_v8, %v853_v8 }
 0x166   :  { %v863_v17 = vsub.f32 %v793_v27, %v291_v13  ;;  %v866_v18 = vsub.f32 %v791_v26, %v288_v14  ;;  %v337_v19 = vsel %vm230_vm1, %v315_v15, 0.0  ;;  %v328_v28 = vsel %vm230_vm1, %v312_v16, 0.0 }
 0x167   :  { %v260_v21 = vpop.xlane.xlu1 %259  ;;  %338 = vadd.xlane.f32.xlu1 %v337_v19  ;;  %359 = vadd.xlane.f32.xlu0 %v358_v20  ;;  %v236_v22 = vpop.xlane.xlu0 %235 }
 0x168   :  { %v289_v23 = vmul.f32 0.125, %v260_v21  ;;  %v281_v24 = vmul.f32 0.125, %v236_v22  ;;  %v323_v25 = vmul.f32 %v863_v17, %v863_v17  ;;  %v320_v30 = vmul.f32 %v866_v18, %v866_v18 }
 0x16a   :  { %v874_v27 = vsub.f32 %v800_v34, %v289_v23  ;;  %v877_v26 = vsub.f32 %v798_v33, %v281_v24  ;;  %v361_v29 = vsel %vm230_vm1, %v323_v25, 0.0  ;;  %v352_v41 = vsel %vm230_vm1, %v320_v30, 0.0 }
 0x16b   :  { %v254_v31 = vpop.xlane.xlu1 %253  ;;  %362 = vadd.xlane.f32.xlu1 %v361_v29  ;;  %329 = vadd.xlane.f32.xlu0 %v328_v28  ;;  %v251_v32 = vpop.xlane.xlu0 %250 }
 0x16c   :  { %v287_v35 = vmul.f32 0.125, %v254_v31  ;;  %v286_v36 = vmul.f32 0.125, %v251_v32  ;;  %v313_v37 = vmul.f32 %v877_v26, %v877_v26  ;;  %v321_v34 = vmul.f32 %v874_v27, %v874_v27 }
 0x16e   :  { %v887_v33 = vsub.f32 %v808_v40, %v287_v35  ;;  %v890_v38 = vsub.f32 %v806_v39, %v286_v36  ;;  %v331_v42 = vsel %vm230_vm1, %v313_v37, 0.0  ;;  %v355_v52 = vsel %vm230_vm1, %v321_v34, 0.0 }
 0x16f   :  { %v248_v43 = vpop.xlane.xlu1 %247  ;;  %353 = vadd.xlane.f32.xlu0 %v352_v41  ;;  %332 = vadd.xlane.f32.xlu1 %v331_v42  ;;  %v245_v44 = vpop.xlane.xlu0 %244 }
 0x170   :  { %v285_v45 = vmul.f32 0.125, %v248_v43  ;;  %v284_v46 = vmul.f32 0.125, %v245_v44  ;;  %v318_v49 = vmul.f32 %v890_v38, %v890_v38  ;;  %v319_v56 = vmul.f32 %v887_v33, %v887_v33 }
 0x172   :  { %v898_v40 = vsub.f32 %v820_v48, %v285_v45  ;;  %v901_v39 = vsub.f32 %v818_v47, %v284_v46  ;;  %v346_v53 = vsel %vm230_vm1, %v318_v49, 0.0  ;;  %v349_v63 = vsel %vm230_vm1, %v319_v56, 0.0  ;;  %v940_v56 = vld [vmem:[%s1062_s3] ss:$0 sm:$0xff] }
 0x173   :  { %v272_v57 = vpop.xlane.xlu1 %271  ;;  %356 = vadd.xlane.f32.xlu1 %v355_v52  ;;  %347 = vadd.xlane.f32.xlu0 %v346_v53  ;;  %v269_v58 = vpop.xlane.xlu0 %268 }
 0x174   :  { %v293_v59 = vmul.f32 0.125, %v272_v57  ;;  %v292_v60 = vmul.f32 0.125, %v269_v58  ;;  %v316_v61 = vmul.f32 %v901_v39, %v901_v39  ;;  %v317_v48 = vmul.f32 %v898_v40, %v898_v40 }
 0x176   :  { %v911_v47 = vsub.f32 %v824_v51, %v293_v59  ;;  %v914_v62 = vsub.f32 %v822_v50, %v292_v60  ;;  %v340_v2 = vsel %vm230_vm1, %v316_v61, 0.0  ;;  %v343_v10 = vsel %vm230_vm1, %v317_v48, 0.0  ;;  %v946_v60 = vld [vmem:[%s1063_s4] ss:$0 sm:$0xff] }
 0x177   :  { %v278_v3 = vpop.xlane.xlu1 %277  ;;  %350 = vadd.xlane.f32.xlu1 %v349_v63  ;;  %341 = vadd.xlane.f32.xlu0 %v340_v2  ;;  %v275_v4 = vpop.xlane.xlu0 %274 }
 0x178   :  { %v295_v5 = vmul.f32 0.125, %v278_v3  ;;  %v294_v6 = vmul.f32 0.125, %v275_v4  ;;  %v324_v9 = vmul.f32 %v914_v62, %v914_v62  ;;  %v325_v12 = vmul.f32 %v911_v47, %v911_v47 }
 0x17a   :  { %v922_v51 = vsub.f32 %v832_v55, %v295_v5  ;;  %v925_v50 = vsub.f32 %v830_v54, %v294_v6  ;;  %v364_v11 = vsel %vm230_vm1, %v324_v9, 0.0  ;;  %v367_v14 = vsel %vm230_vm1, %v325_v12, 0.0 }
 0x17b   :  { %344 = vadd.xlane.f32.xlu1 %v343_v10  ;;  %365 = vadd.xlane.f32.xlu0 %v364_v11 }
 0x17c   :  { %v326_v13 = vmul.f32 %v925_v50, %v925_v50  ;;  %v327_v55 = vmul.f32 %v922_v51, %v922_v51 }
 0x17e   :  { %v370_v15 = vsel %vm230_vm1, %v326_v13, 0.0  ;;  %v373_v54 = vsel %vm230_vm1, %v327_v55, 0.0 }
 0x17f   :  { %368 = vadd.xlane.f32.xlu1 %v367_v14  ;;  %371 = vadd.xlane.f32.xlu0 %v370_v15 }
 0x183   :  { %374 = vadd.xlane.f32.xlu1 %v373_v54 }
 0x1ec   :  { %v336_v16 = vpop.xlane.xlu0 %335 }
 0x1ed   :  { %v378_v19 = vmul.f32 0.125, %v336_v16 }
 0x1ef   :  { %v394_v20 = vadd.f32 1e-06, %v378_v19 }
 0x1f0   :  { %v339_v21 = vpop.xlane.xlu1 %338  ;;  %v360_v22 = vpop.xlane.xlu0 %359 }
 0x1f1   :  { %675 = vrsqrt.f32 %v394_v20  ;;  %v379_v23 = vmul.f32 0.125, %v339_v21  ;;  %v386_v24 = vmul.f32 0.125, %v360_v22 }
 0x1f3   :  { %v395_v25 = vadd.f32 1e-06, %v379_v23  ;;  %v402_v28 = vadd.f32 1e-06, %v386_v24 }
 0x1f4   :  { %v363_v29 = vpop.xlane.xlu1 %362  ;;  %v330_v30 = vpop.xlane.xlu0 %329 }
 0x1f5   :  { %677 = vrsqrt.f32 %v395_v25  ;;  %v387_v31 = vmul.f32 0.125, %v363_v29  ;;  %v376_v32 = vmul.f32 0.125, %v330_v30 }
 0x1f6   :  { %679 = vrsqrt.f32 %v402_v28 }
 0x1f7   :  { %v403_v35 = vadd.f32 1e-06, %v387_v31  ;;  %v392_v36 = vadd.f32 1e-06, %v376_v32 }
 0x1f8   :  { %v333_v37 = vpop.xlane.xlu1 %332  ;;  %v354_v34 = vpop.xlane.xlu0 %353 }
 0x1f9   :  { %681 = vrsqrt.f32 %v403_v35  ;;  %v377_v41 = vmul.f32 0.125, %v333_v37  ;;  %v384_v42 = vmul.f32 0.125, %v354_v34 }
 0x1fa   :  { %683 = vrsqrt.f32 %v392_v36 }
 0x1fb   :  { %v393_v43 = vadd.f32 1e-06, %v377_v41  ;;  %v400_v44 = vadd.f32 1e-06, %v384_v42 }
 0x1fc   :  { %v357_v45 = vpop.xlane.xlu1 %356  ;;  %v348_v46 = vpop.xlane.xlu0 %347 }
 0x1fd   :  { %685 = vrsqrt.f32 %v393_v43  ;;  %v385_v49 = vmul.f32 0.125, %v357_v45  ;;  %v382_v52 = vmul.f32 0.125, %v348_v46 }
 0x1fe   :  { %v676_v53 = vpop.eup %675  ;;  %687 = vrsqrt.f32 %v400_v44 }
 0x1ff   :  { %v426_v57 = vmul.f32 %v676_v53, %v846_v1  ;;  %v401_v58 = vadd.f32 1e-06, %v385_v49  ;;  %v398_v59 = vadd.f32 1e-06, %v382_v52 }
 0x200   :  { %v351_v61 = vpop.xlane.xlu1 %350  ;;  %v342_v48 = vpop.xlane.xlu0 %341 }
 0x201   :  { %v449_v63 = vmul.f32 %v940_v56, %v426_v57  ;;  %689 = vrsqrt.f32 %v401_v58  ;;  %v383_v2 = vmul.f32 0.125, %v351_v61  ;;  %v380_v3 = vmul.f32 0.125, %v342_v48 }
 0x202   :  { %v678_v4 = vpop.eup %677  ;;  %691 = vrsqrt.f32 %v398_v59 }
 0x203   :  { %v680_v5 = vpop.eup %679  ;;  %v472_v6 = vadd.f32 %v946_v60, %v449_v63  ;;  %v427_v1 = vmul.f32 %v678_v4, %v850_v7  ;;  %v399_v9 = vadd.f32 1e-06, %v383_v2  ;;  %v396_v10 = vadd.f32 1e-06, %v380_v3 }
 0x204   :  { %v434_v11 = vmul.f32 %v680_v5, %v843_v0  ;;  %v345_v12 = vpop.xlane.xlu1 %344  ;;  %v366_v13 = vpop.xlane.xlu0 %365 }
 0x205   :  { %v611_v14 = vpack.c.bf16 %v472_v6, %v472_v6  ;;  %v450_v15 = vmul.f32 %v940_v56, %v427_v1  ;;  %693 = vrsqrt.f32 %v399_v9  ;;  %v381_v55 = vmul.f32 0.125, %v345_v12 }
 0x206   :  { %v682_v54 = vpop.eup %681  ;;  %v457_v16 = vmul.f32 %v940_v56, %v434_v11  ;;  %695 = vrsqrt.f32 %v396_v10  ;;  %v388_v19 = vmul.f32 0.125, %v366_v13 }
 0x207   :  { %v684_v20 = vpop.eup %683  ;;  %553 = vst.msk [vmem:[%s1064_s5 + $0x8] sm:$0xf] %vm550_vm2, %v611_v14  ;;  %v473_v0 = vadd.f32 %v946_v60, %v450_v15  ;;  %v435_v7 = vmul.f32 %v682_v54, %v863_v17  ;;  %v397_v21 = vadd.f32 1e-06, %v381_v55 }
 0x208   :  { %v480_v22 = vadd.f32 %v946_v60, %v457_v16  ;;  %v424_v23 = vmul.f32 %v684_v20, %v853_v8  ;;  %v404_v24 = vadd.f32 1e-06, %v388_v19  ;;  %v369_v25 = vpop.xlane.xlu1 %368  ;;  %v372_v28 = vpop.xlane.xlu0 %371 }
 0x209   :  { %v612_v29 = vpack.c.bf16 %v473_v0, %v473_v0  ;;  %v458_v30 = vmul.f32 %v940_v56, %v435_v7  ;;  %697 = vrsqrt.f32 %v397_v21  ;;  %v389_v31 = vmul.f32 0.125, %v369_v25 }
 0x20a   :  { %v686_v32 = vpop.eup %685  ;;  %v619_v35 = vpack.c.bf16 %v480_v22, %v480_v22  ;;  %v447_v36 = vmul.f32 %v940_v56, %v424_v23  ;;  %699 = vrsqrt.f32 %v404_v24  ;;  %v390_v37 = vmul.f32 0.125, %v372_v28 }
 0x20b   :  { %v688_v17 = vpop.eup %687  ;;  %554 = vst.msk [vmem:[%s1064_s5 + $0xc] sm:$0xf] %vm550_vm2, %v612_v29  ;;  %v481_v8 = vadd.f32 %v946_v60, %v458_v30  ;;  %v425_v34 = vmul.f32 %v686_v32, %v877_v26  ;;  %v405_v41 = vadd.f32 1e-06, %v389_v31 }
 0x20c   :  { %561 = vst.msk [vmem:[%s1064_s5 + $0x28] sm:$0xf] %vm550_vm2, %v619_v35  ;;  %v470_v42 = vadd.f32 %v946_v60, %v447_v36  ;;  %v432_v43 = vmul.f32 %v688_v17, %v866_v18  ;;  %v406_v44 = vadd.f32 1e-06, %v390_v37  ;;  %v375_v45 = vpop.xlane.xlu1 %374 }
 0x20d   :  { %v620_v46 = vpack.c.bf16 %v481_v8, %v481_v8  ;;  %v448_v49 = vmul.f32 %v940_v56, %v425_v34  ;;  %701 = vrsqrt.f32 %v405_v41  ;;  %v391_v52 = vmul.f32 0.125, %v375_v45 }
 0x20e   :  { %v690_v53 = vpop.eup %689  ;;  %v609_v57 = vpack.c.bf16 %v470_v42, %v470_v42  ;;  %v455_v26 = vmul.f32 %v940_v56, %v432_v43  ;;  %703 = vrsqrt.f32 %v406_v44 }
 0x20f   :  { %v692_v58 = vpop.eup %691  ;;  %562 = vst.msk [vmem:[%s1064_s5 + $0x2c] sm:$0xf] %vm550_vm2, %v620_v46  ;;  %v471_v18 = vadd.f32 %v946_v60, %v448_v49  ;;  %v433_v59 = vmul.f32 %v690_v53, %v874_v27  ;;  %v407_v61 = vadd.f32 1e-06, %v391_v52 }
 0x210   :  { %551 = vst.msk [vmem:[%s1064_s5] sm:$0xf] %vm550_vm2, %v609_v57  ;;  %v478_v48 = vadd.f32 %v946_v60, %v455_v26  ;;  %v430_v63 = vmul.f32 %v692_v58, %v890_v38 }
 0x211   :  { %v610_v2 = vpack.c.bf16 %v471_v18, %v471_v18  ;;  %v456_v3 = vmul.f32 %v940_v56, %v433_v59  ;;  %705 = vrsqrt.f32 %v407_v61 }
 0x212   :  { %v694_v4 = vpop.eup %693  ;;  %v617_v5 = vpack.c.bf16 %v478_v48, %v478_v48  ;;  %v453_v6 = vmul.f32 %v940_v56, %v430_v63 }
 0x213   :  { %v696_v1 = vpop.eup %695  ;;  %552 = vst.msk [vmem:[%s1064_s5 + $0x4] sm:$0xf] %vm550_vm2, %v610_v2  ;;  %v479_v27 = vadd.f32 %v946_v60, %v456_v3  ;;  %v431_v9 = vmul.f32 %v694_v4, %v887_v33 }
 0x214   :  { %559 = vst.msk [vmem:[%s1064_s5 + $0x20] sm:$0xf] %vm550_vm2, %v617_v5  ;;  %v476_v38 = vadd.f32 %v946_v60, %v453_v6  ;;  %v428_v10 = vmul.f32 %v696_v1, %v901_v39 }
 0x215   :  { %v618_v11 = vpack.c.bf16 %v479_v27, %v479_v27  ;;  %v454_v12 = vmul.f32 %v940_v56, %v431_v9 }
 0x216   :  { %v698_v13 = vpop.eup %697  ;;  %v615_v14 = vpack.c.bf16 %v476_v38, %v476_v38  ;;  %v451_v15 = vmul.f32 %v940_v56, %v428_v10 }
 0x217   :  { %v700_v55 = vpop.eup %699  ;;  %560 = vst.msk [vmem:[%s1064_s5 + $0x24] sm:$0xf] %vm550_vm2, %v618_v11  ;;  %v477_v33 = vadd.f32 %v946_v60, %v454_v12  ;;  %v429_v54 = vmul.f32 %v698_v13, %v898_v40 }
 0x218   :  { %557 = vst.msk [vmem:[%s1064_s5 + $0x18] sm:$0xf] %vm550_vm2, %v615_v14  ;;  %v474_v39 = vadd.f32 %v946_v60, %v451_v15  ;;  %v436_v16 = vmul.f32 %v700_v55, %v914_v62 }
 0x219   :  { %v616_v19 = vpack.c.bf16 %v477_v33, %v477_v33  ;;  %v452_v20 = vmul.f32 %v940_v56, %v429_v54 }
 0x21a   :  { %v702_v0 = vpop.eup %701  ;;  %v613_v7 = vpack.c.bf16 %v474_v39, %v474_v39  ;;  %v459_v21 = vmul.f32 %v940_v56, %v436_v16 }
 0x21b   :  { %v704_v22 = vpop.eup %703  ;;  %558 = vst.msk [vmem:[%s1064_s5 + $0x1c] sm:$0xf] %vm550_vm2, %v616_v19  ;;  %v475_v40 = vadd.f32 %v946_v60, %v452_v20  ;;  %v437_v23 = vmul.f32 %v702_v0, %v911_v47 }
 0x21c   :  { %555 = vst.msk [vmem:[%s1064_s5 + $0x10] sm:$0xf] %vm550_vm2, %v613_v7  ;;  %v482_v62 = vadd.f32 %v946_v60, %v459_v21  ;;  %v438_v24 = vmul.f32 %v704_v22, %v925_v50 }
 0x21d   :  { %v614_v25 = vpack.c.bf16 %v475_v40, %v475_v40  ;;  %v460_v28 = vmul.f32 %v940_v56, %v437_v23 }
 0x21e   :  { %v706_v29 = vpop.eup %705  ;;  %v621_v30 = vpack.c.bf16 %v482_v62, %v482_v62  ;;  %v461_v31 = vmul.f32 %v940_v56, %v438_v24 }
 0x21f   :  { %556 = vst.msk [vmem:[%s1064_s5 + $0x14] sm:$0xf] %vm550_vm2, %v614_v25  ;;  %v483_v47 = vadd.f32 %v946_v60, %v460_v28  ;;  %v439_v32 = vmul.f32 %v706_v29, %v922_v51 }
 0x220   :  { %563 = vst.msk [vmem:[%s1064_s5 + $0x30] sm:$0xf] %vm550_vm2, %v621_v30  ;;  %v484_v50 = vadd.f32 %v946_v60, %v461_v31 }
 0x221   :  { %v622_v35 = vpack.c.bf16 %v483_v47, %v483_v47  ;;  %v462_v36 = vmul.f32 %v940_v56, %v439_v32 }
 0x222   :  { %v623_v37 = vpack.c.bf16 %v484_v50, %v484_v50 }
 0x223   :  { %564 = vst.msk [vmem:[%s1064_s5 + $0x34] sm:$0xf] %vm550_vm2, %v622_v35  ;;  %v485_v17 = vadd.f32 %v946_v60, %v462_v36 }
 0x224   :  { %565 = vst.msk [vmem:[%s1064_s5 + $0x38] sm:$0xf] %vm550_vm2, %v623_v37 }
 0x225   :  { %v624_v51 = vpack.c.bf16 %v485_v17, %v485_v17 }
 0x227   :  { %566 = vst.msk [vmem:[%s1064_s5 + $0x3c] sm:$0xf] %vm550_vm2, %v624_v51 }

</bundles_post_ra>
